<compile_context>
chip_gen: v7x
topology: tpu7x:2x2x1
jax: 0.10.0
libtpu: 0.0.40
codegen_flags: <defaults>
</compile_context>

<pallas_src>
import functools

import numpy as np
import jax
import jax.numpy as jnp
from jax.experimental import pallas as pl
from jax.experimental.pallas import tpu as pltpu

EPS = 1e-5
LEAKY_SLOPE = 0.01
MXU_DTYPE = jnp.bfloat16         # storage dtype for large intermediates + MXU operands


@functools.lru_cache(maxsize=None)
def _hw_budget():
    """(vmem_limit_bytes, row_tile) chosen per TPU generation."""
    try:
        cap = int(pltpu.get_tpu_info().vmem_capacity_bytes)
    except Exception:
        cap = 0
    if cap >= (96 << 20):          # v5e / v6e: 128 MiB physical VMEM
        return (80 << 20, 512)
    return (40 << 20, 256)         # v7x (64 MiB physical) or unknown -> conservative


def _cparams(dims):
    vmem_limit, _ = _hw_budget()
    return pltpu.CompilerParams(dimension_semantics=dims,
                                vmem_limit_bytes=vmem_limit)


def _tile_m():
    return _hw_budget()[1]


# --------------------------------------------------------------------------
# Pallas kernels
# --------------------------------------------------------------------------

def _in_norm_conv1x1_kernel(x_ref, s_ref, b_ref, w_ref, xn_ref, c1_ref):
    # Fused in_norm (folded BN + leaky_relu) and the plain 1x1-conv branch.
    y = x_ref[...] * s_ref[...] + b_ref[...]
    y = jnp.where(y >= 0, y, LEAKY_SLOPE * y)
    yb = y.astype(xn_ref.dtype)                       # bf16 store (halves HBM bytes)
    xn_ref[...] = yb
    c1_ref[...] = jnp.dot(yb, w_ref[...],
                          preferred_element_type=jnp.float32).astype(c1_ref.dtype)


def _catdown_kernel(*refs):
    # aspp_catdown without materializing the channel concat:
    #   out = sum_i leaky_relu(branch_i * scale_i + bias_i) @ W_down_i
    # refs = [x0,s0,b0,w0, x1,s1,b1,w1, ..., out, acc_scratch]
    o_ref = refs[-2]
    acc_ref = refs[-1]                                # f32 VMEM scratch accumulator
    n_br = (len(refs) - 2) // 4
    for i in range(n_br):
        x_ref, s_ref, b_ref, w_ref = refs[4 * i:4 * i + 4]
        y = x_ref[...] * s_ref[...] + b_ref[...]      # bf16 * f32 -> f32
        y = jnp.where(y >= 0, y, LEAKY_SLOPE * y)
        d = jnp.dot(y.astype(w_ref.dtype), w_ref[...],
                    preferred_element_type=jnp.float32)
        if i == 0:
            acc_ref[...] = d
        else:
            acc_ref[...] += d
    o_ref[...] = acc_ref[...].astype(o_ref.dtype)


def _matmul_kernel(a_ref, b_ref, o_ref):
    o_ref[...] = jnp.dot(a_ref[...], b_ref[...],
                         preferred_element_type=jnp.float32).astype(o_ref.dtype)


def _bmm_kernel(a_ref, x_ref, o_ref):
    # A (Hout,Hin) broadcast over batch; X block (1,Hin,TN) -> O block (1,Hout,TN)
    o_ref[0] = jnp.dot(a_ref[...], x_ref[0],
                       preferred_element_type=jnp.float32).astype(o_ref.dtype)


def _wresample_kernel(rx_ref, t_ref, o_ref):
    # Row-wise W-axis resample: o[r] = Rx @ t[r]   (t block (TB,Win,C))
    # Writes the (row, Wout, C) layout directly -> no host transpose needed.
    # TODO(synk): batch the TB small dots into one (Wout,Win)x(Win,TB*C) dot via
    # an in-kernel transpose to raise MXU occupancy on v6e/v7x.
    rx = rx_ref[...]
    for r in range(t_ref.shape[0]):
        o_ref[r] = jnp.dot(rx, t_ref[r],
                           preferred_element_type=jnp.float32).astype(o_ref.dtype)


def _dw3_kernel(x_hbm, w1_ref, w2_ref, w3_ref, o1_ref, o2_ref, o3_ref,
                xbuf, accbuf, sem, *, dils, dmax, strip, n_strips):
    # Three dilated depthwise 3x3 branches, strip-tiled over H with a dmax-row
    # halo.  The halo window is DMA'd straight from the unpadded HBM activation
    # (no host-side jnp.pad round trip); out-of-image halo rows are zero-filled
    # in the VMEM strip buffer, W-axis halo is handled with static slice bounds.
    n = pl.program_id(0)
    s = pl.program_id(1)
    S = strip
    W = o1_ref.shape[2]

    def copy_rows(src_row0, dst_row0, nrows):
        cp = pltpu.make_async_copy(
            x_hbm.at[n, pl.ds(src_row0, nrows)],
            xbuf.at[pl.ds(dst_row0, nrows)],
            sem)
        cp.start()
        cp.wait()
        # TODO(synk): double-buffer this DMA (prefetch strip s+1) to hide the
        # copy behind the 27-tap compute.

    def zero_rows(r0, r1):
        xbuf[r0:r1] = jnp.zeros((r1 - r0,) + xbuf.shape[1:], xbuf.dtype)

    if n_strips == 1:
        zero_rows(0, dmax)
        zero_rows(S + dmax, S + 2 * dmax)
        copy_rows(0, dmax, S)
    else:
        @pl.when(s == 0)
        def _():
            zero_rows(0, dmax)
            copy_rows(0, dmax, S + dmax)

        if n_strips > 2:
            @pl.when((s > 0) & (s < n_strips - 1))
            def _():
                copy_rows(s * S - dmax, 0, S + 2 * dmax)

        @pl.when(s == n_strips - 1)
        def _():
            zero_rows(S + dmax, S + 2 * dmax)
            copy_rows(s * S - dmax, 0, S + dmax)

    for w_ref, o_ref, d in zip((w1_ref, w2_ref, w3_ref),
                               (o1_ref, o2_ref, o3_ref), dils):
        # centre tap covers the full strip -> plain assignment (no explicit zeroing)
        accbuf[...] = xbuf[dmax:dmax + S] * w_ref[1, 1]
        for ky in range(3):
            ro = dmax + (ky - 1) * d
            for kx in range(3):
                if ky == 1 and kx == 1:
                    continue
                off = (kx - 1) * d
                a = max(0, -off)
                b = min(W, W - off)
                if b <= a:
                    continue   # tap falls entirely outside the image width
                # TODO(synk): realign the 8-sublane-misaligned W offsets with
                # pltpu.roll (XLU) instead of strided slice copies.
                accbuf[:, a:b, :] += xbuf[ro:ro + S, a + off:b + off, :] * w_ref[ky, kx]
        o_ref[0] = accbuf[...].astype(o_ref.dtype)


# --------------------------------------------------------------------------
# Pallas wrappers
# --------------------------------------------------------------------------

def in_norm_conv1x1(x2d, scale, bias, w):
    M, Cin = x2d.shape
    Cout = w.shape[1]
    tm = min(M, _tile_m())
    return pl.pallas_call(
        _in_norm_conv1x1_kernel,
        grid=(pl.cdiv(M, tm),),
        out_shape=(jax.ShapeDtypeStruct((M, Cin), MXU_DTYPE),
                   jax.ShapeDtypeStruct((M, Cout), MXU_DTYPE)),
        in_specs=[pl.BlockSpec((tm, Cin), lambda i: (i, 0)),
                  pl.BlockSpec((1, Cin), lambda i: (0, 0)),
                  pl.BlockSpec((1, Cin), lambda i: (0, 0)),
                  pl.BlockSpec((Cin, Cout), lambda i: (0, 0))],
        out_specs=[pl.BlockSpec((tm, Cin), lambda i: (i, 0)),
                   pl.BlockSpec((tm, Cout), lambda i: (i, 0))],
        compiler_params=_cparams(("parallel",)),
    )(x2d, scale, bias, w)


def catdown(acts, scales, biases, weights, Cout):
    M = acts[0].shape[0]
    tm = min(M, _tile_m())
    in_specs, args = [], []
    for a, s, b, w in zip(acts, scales, biases, weights):
        C = a.shape[1]
        in_specs += [pl.BlockSpec((tm, C), lambda i: (i, 0)),
                     pl.BlockSpec((1, C), lambda i: (0, 0)),
                     pl.BlockSpec((1, C), lambda i: (0, 0)),
                     pl.BlockSpec((C, Cout), lambda i: (0, 0))]
        args += [a, s, b, w]
    return pl.pallas_call(
        _catdown_kernel,
        grid=(pl.cdiv(M, tm),),
        out_shape=jax.ShapeDtypeStruct((M, Cout), MXU_DTYPE),
        in_specs=in_specs,
        out_specs=pl.BlockSpec((tm, Cout), lambda i: (i, 0)),
        scratch_shapes=[pltpu.VMEM((tm, Cout), jnp.float32)],
        compiler_params=_cparams(("parallel",)),
    )(*args)


def matmul(a, b, out_dtype=jnp.float32):
    M, K = a.shape
    N = b.shape[1]
    tm = min(M, _tile_m())
    return pl.pallas_call(
        _matmul_kernel,
        grid=(pl.cdiv(M, tm),),
        out_shape=jax.ShapeDtypeStruct((M, N), out_dtype),
        in_specs=[pl.BlockSpec((tm, K), lambda i: (i, 0)),
                  pl.BlockSpec((K, N), lambda i: (0, 0))],
        out_specs=pl.BlockSpec((tm, N), lambda i: (i, 0)),
        compiler_params=_cparams(("parallel",)),
    )(a, b)


def _pick_strip(H, W, C, dmax, budget):
    """Largest H-strip (dividing H, >= dmax when multi-strip) that fits the budget."""
    def need(S):
        # xbuf (bf16) + accbuf (f32) + three double-buffered bf16 output blocks
        return ((S + 2 * dmax) * 2 + S * 4 + 3 * 2 * S * 2) * W * C
    if need(H) <= budget:
        return H
    divs = [S for S in range(dmax, H) if H % S == 0]
    fits = [S for S in divs if need(S) <= budget]
    if fits:
        return max(fits)
    return min(divs) if divs else H


def dw3(x, w1, w2, w3, dils):
    # Fused three-branch dilated depthwise 3x3 conv (SAME padding = dilation),
    # strip-tiled over H with a max-dilation halo fetched by manual DMA.
    N, H, W, C = x.shape
    dmax = max(dils)
    vmem_limit, _ = _hw_budget()
    strip = _pick_strip(H, W, C, dmax, vmem_limit // 2)
    n_strips = H // strip
    kern = functools.partial(_dw3_kernel, dils=tuple(dils), dmax=dmax,
                             strip=strip, n_strips=n_strips)
    return pl.pallas_call(
        kern,
        grid=(N, n_strips),
        out_shape=tuple(jax.ShapeDtypeStruct((N, H, W, C), MXU_DTYPE)
                        for _ in range(3)),
        in_specs=[pl.BlockSpec(memory_space=pl.ANY),           # xn stays in HBM
                  pl.BlockSpec((3, 3, 1, C), lambda n, s: (0, 0, 0, 0)),
                  pl.BlockSpec((3, 3, 1, C), lambda n, s: (0, 0, 0, 0)),
                  pl.BlockSpec((3, 3, 1, C), lambda n, s: (0, 0, 0, 0))],
        out_specs=[pl.BlockSpec((1, strip, W, C), lambda n, s: (n, s, 0, 0))] * 3,
        scratch_shapes=[pltpu.VMEM((strip + 2 * dmax, W, C), MXU_DTYPE),
                        pltpu.VMEM((strip, W, C), jnp.float32),
                        pltpu.SemaphoreType.DMA],
        compiler_params=_cparams(("parallel", "parallel")),
    )(x, w1, w2, w3)


def resample(x, Ry, Rx, out_dtype=jnp.float32):
    # Separable spatial resample: out[n,i,j,c] = sum_{h,w} Ry[i,h] Rx[j,w] x[n,h,w,c]
    # H-pass: batched matmul over lanes; W-pass: per-row matmul kernel that
    # writes the target layout directly (no host-side transposes).
    N, Hin, Win, C = x.shape
    Hout, Wout = Ry.shape[0], Rx.shape[0]
    Ry = jnp.asarray(Ry).astype(MXU_DTYPE)
    Rx = jnp.asarray(Rx).astype(MXU_DTYPE)
    xb = x.astype(MXU_DTYPE)

    WinC = Win * C
    TN = min(WinC, 4096)
    t = pl.pallas_call(
        _bmm_kernel,
        grid=(N, pl.cdiv(WinC, TN)),
        out_shape=jax.ShapeDtypeStruct((N, Hout, WinC), MXU_DTYPE),
        in_specs=[pl.BlockSpec((Hout, Hin), lambda n, j: (0, 0)),
                  pl.BlockSpec((1, Hin, TN), lambda n, j: (n, 0, j))],
        out_specs=pl.BlockSpec((1, Hout, TN), lambda n, j: (n, 0, j)),
        compiler_params=_cparams(("parallel", "parallel")),
    )(Ry, xb.reshape(N, Hin, WinC))

    NH = N * Hout
    TB = min(NH, 8)
    out = pl.pallas_call(
        _wresample_kernel,
        grid=(pl.cdiv(NH, TB),),
        out_shape=jax.ShapeDtypeStruct((NH, Wout, C), out_dtype),
        in_specs=[pl.BlockSpec((Wout, Win), lambda i: (0, 0)),
                  pl.BlockSpec((TB, Win, C), lambda i: (i, 0, 0))],
        out_specs=pl.BlockSpec((TB, Wout, C), lambda i: (i, 0, 0)),
        compiler_params=_cparams(("parallel",)),
    )(Rx, t.reshape(NH, Win, C))
    return out.reshape(N, Hout, Wout, C)


# --------------------------------------------------------------------------
# Resampling matrices (align_corners=True bilinear, PyTorch adaptive avg pool)
# --------------------------------------------------------------------------

def _bilinear_matrix(in_size, out_size):
    R = np.zeros((out_size, in_size), np.float32)
    if out_size == 1:
        R[0, 0] = 1.0
        return R
    scale = (in_size - 1) / (out_size - 1)
    for o in range(out_size):
        src = o * scale
        i0 = min(int(np.floor(src)), in_size - 1)
        i1 = min(i0 + 1, in_size - 1)
        f = src - i0
        R[o, i0] += 1.0 - f
        R[o, i1] += f
    return R


def _adaptive_avg_matrix(in_size, out_size):
    R = np.zeros((out_size, in_size), np.float32)
    for o in range(out_size):
        s = (o * in_size) // out_size
        e = -(-((o + 1) * in_size) // out_size)  # ceil
        R[o, s:e] = 1.0 / (e - s)
    return R


# --------------------------------------------------------------------------
# Module: parameters + forward
# --------------------------------------------------------------------------

def init_params(key, in_chs, out_chs):
    ks = jax.random.split(key, 10)
    ccat = 3 * in_chs + 2 * out_chs

    def conv1x1_w(k, ci, co):
        # PyTorch weight (co, ci, 1, 1) -> matmul layout (ci, co)
        w = 0.1 * jax.random.normal(k, (co, ci, 1, 1), jnp.float32)
        return jnp.transpose(w.reshape(co, ci), (1, 0))

    def dw_w(k, ci):
        # PyTorch depthwise weight (ci, 1, 3, 3) -> kernel layout (3, 3, 1, ci)
        w = 0.1 * jax.random.normal(k, (ci, 1, 3, 3), jnp.float32)
        return jnp.transpose(w[:, 0], (1, 2, 0)).reshape(3, 3, 1, ci)

    def bn(k, c):
        a, b = jax.random.split(k)
        return dict(
            g=(1.0 + 0.1 * jax.random.normal(a, (1, c))).astype(jnp.float32),
            b=(0.1 * jax.random.normal(b, (1, c))).astype(jnp.float32),
            m=(0.05 * jnp.arange(c, dtype=jnp.float32)).reshape(1, c),
            v=(1.0 + 0.02 * jnp.arange(c, dtype=jnp.float32)).reshape(1, c),
        )

    bn_in, bn_cat = bn(ks[0], in_chs), bn(ks[1], ccat)
    return dict(
        in_g=bn_in['g'], in_b=bn_in['b'], in_m=bn_in['m'], in_v=bn_in['v'],
        cat_g=bn_cat['g'], cat_b=bn_cat['b'], cat_m=bn_cat['m'], cat_v=bn_cat['v'],
        w_gave=conv1x1_w(ks[2], in_chs, out_chs),
        w_1x1=conv1x1_w(ks[3], in_chs, out_chs),
        w_bra1=dw_w(ks[4], in_chs),
        w_bra2=dw_w(ks[5], in_chs),
        w_bra3=dw_w(ks[6], in_chs),
        w_down=conv1x1_w(ks[7], ccat, out_chs),
    )


def dsaspp_forward(x_nchw, p, up_ratio=2, aspp_dilate=(12, 24, 36)):
    N, Cin, H, W = x_nchw.shape
    Cout = p['w_1x1'].shape[1]
    M = N * H * W
    x = jnp.transpose(x_nchw, (0, 2, 3, 1)).astype(jnp.float32)   # NHWC

    # fold in_norm BN stats into scale/bias (inference-mode InPlaceABN)
    s_in = p['in_g'] * jax.lax.rsqrt(p['in_v'] + EPS)
    b_in = p['in_b'] - p['in_m'] * s_in

    # fused: in_norm (+ leaky_relu) and the plain 1x1-conv branch (bf16 outputs)
    xn, c1 = in_norm_conv1x1(x.reshape(M, Cin), s_in, b_in,
                             p['w_1x1'].astype(MXU_DTYPE))
    xn4 = xn.reshape(N, H, W, Cin)

    # ASPP depthwise dilated 3x3 branches: one strip-tiled kernel, halo by DMA
    bra1, bra2, bra3 = dw3(xn4, p['w_bra1'], p['w_bra2'], p['w_bra3'], aspp_dilate)

    # global branch: AdaptiveAvgPool2d((3,3)) -> 1x1 conv -> bilinear up to (H, W)
    # TODO(synk): fold the 3x3 adaptive-avg pooling into the in_norm kernel so xn
    # is not re-read from HBM by this branch.
    pooled = resample(xn4, _adaptive_avg_matrix(H, 3), _adaptive_avg_matrix(W, 3),
                      out_dtype=MXU_DTYPE)
    gp = matmul(pooled.reshape(N * 9, Cin), p['w_gave'].astype(MXU_DTYPE),
                out_dtype=MXU_DTYPE).reshape(N, 3, 3, Cout)
    gp_up = resample(gp, _bilinear_matrix(3, H), _bilinear_matrix(3, W),
                     out_dtype=MXU_DTYPE)

    # aspp_catdown: ABN + conv_down, computed WITHOUT materializing the concat.
    # cat channel order matches torch.cat: [bra1, gp_up, bra2, c1, bra3]
    s_cat = p['cat_g'] * jax.lax.rsqrt(p['cat_v'] + EPS)
    b_cat = p['cat_b'] - p['cat_m'] * s_cat
    widths = [Cin, Cout, Cin, Cout, Cin]
    offs = np.cumsum([0] + widths)
    acts = [bra1.reshape(M, Cin), gp_up.reshape(M, Cout), bra2.reshape(M, Cin),
            c1, bra3.reshape(M, Cin)]
    scales = [s_cat[:, offs[i]:offs[i + 1]] for i in range(5)]
    biases = [b_cat[:, offs[i]:offs[i + 1]] for i in range(5)]
    wsplit = [p['w_down'][offs[i]:offs[i + 1], :].astype(MXU_DTYPE) for i in range(5)]
    down = catdown(acts, scales, biases, wsplit, Cout).reshape(N, H, W, Cout)

    # conv_down is declared with padding=1 on a bias-free 1x1 conv, so its border
    # rows/cols are exact zeros.  Instead of materializing the padded tensor we
    # fold the zero border into the final bilinear matrices (drop the columns
    # that would multiply zeros) -> bit-identical, one less HBM round trip.
    Ho, Wo = int(H * up_ratio), int(W * up_ratio)
    Rh = _bilinear_matrix(H + 2, Ho)[:, 1:H + 1]
    Rw = _bilinear_matrix(W + 2, Wo)[:, 1:W + 1]
    out = resample(down, Rh, Rw, out_dtype=jnp.float32)
    return jnp.transpose(out, (0, 3, 1, 2))                       # back to NCHW


if __name__ == "__main__":
    key = jax.random.PRNGKey(0)
    kx, kp = jax.random.split(key)
    N, Cin, H, W = 2, 4, 16, 16
    Cout = 8
    x = jax.random.normal(kx, (N, Cin, H, W), jnp.float32)
    params = init_params(kp, Cin, Cout)

    out = dsaspp_forward(x, params, up_ratio=2)
    out = jax.block_until_ready(out)
    assert out.shape == (N, Cout, H * 2, W * 2), out.shape
    assert bool(jnp.all(jnp.isfinite(out)))
    print("KERNEL_OK")
</pallas_src>

<mosaic_0001>
module attributes {stable_mosaic.version = 11 : i64} {
  func.func @_in_norm_conv1x1_kernel(%arg0: i32, %arg1: memref<256x4xf32, #tpu.memory_space<vmem>>, %arg2: memref<1x4xf32, #tpu.memory_space<vmem>>, %arg3: memref<1x4xf32, #tpu.memory_space<vmem>>, %arg4: memref<4x8xbf16, #tpu.memory_space<vmem>>, %arg5: memref<256x4xbf16, #tpu.memory_space<vmem>>, %arg6: memref<256x8xbf16, #tpu.memory_space<vmem>>) attributes {dimension_semantics = [#tpu.dimension_semantics<parallel>], iteration_bounds = array<i64: 2>, scalar_prefetch = 0 : i64, scratch_operands = 0 : i64, tpu.core_type = #tpu.core_type<tc>, window_params = [{transform_indices = @transform_0, window_bounds = array<i64: 256, 4>}, {pipeline_mode = #tpu.pipeline_mode<synchronous>, transform_indices = @transform_1, window_bounds = array<i64: 1, 4>}, {pipeline_mode = #tpu.pipeline_mode<synchronous>, transform_indices = @transform_2, window_bounds = array<i64: 1, 4>}, {pipeline_mode = #tpu.pipeline_mode<synchronous>, transform_indices = @transform_3, window_bounds = array<i64: 4, 8>}, {transform_indices = @transform_4, window_bounds = array<i64: 256, 4>}, {transform_indices = @transform_5, window_bounds = array<i64: 256, 8>}]} {
    %c0 = arith.constant 0 : index
    %c0_0 = arith.constant 0 : index
    %0 = vector.load %arg1[%c0, %c0_0] : memref<256x4xf32, #tpu.memory_space<vmem>>, vector<256x4xf32>
    %c0_1 = arith.constant 0 : index
    %c0_2 = arith.constant 0 : index
    %1 = vector.load %arg2[%c0_1, %c0_2] : memref<1x4xf32, #tpu.memory_space<vmem>>, vector<1x4xf32>
    %2 = vector.broadcast %1 : vector<1x4xf32> to vector<256x4xf32>
    %3 = arith.mulf %0, %2 : vector<256x4xf32>
    %c0_3 = arith.constant 0 : index
    %c0_4 = arith.constant 0 : index
    %4 = vector.load %arg3[%c0_3, %c0_4] : memref<1x4xf32, #tpu.memory_space<vmem>>, vector<1x4xf32>
    %5 = vector.broadcast %4 : vector<1x4xf32> to vector<256x4xf32>
    %6 = arith.addf %3, %5 : vector<256x4xf32>
    %cst = arith.constant 0.000000e+00 : f32
    %7 = vector.broadcast %cst : f32 to vector<256x4xf32>
    %8 = arith.cmpf oge, %6, %7 : vector<256x4xf32>
    %cst_5 = arith.constant 0.00999999977 : f32
    %9 = vector.broadcast %cst_5 : f32 to vector<256x4xf32>
    %10 = arith.mulf %9, %6 : vector<256x4xf32>
    %11 = arith.select %8, %6, %10 : vector<256x4xi1>, vector<256x4xf32>
    %12 = arith.truncf %11 : vector<256x4xf32> to vector<256x4xbf16>
    %c0_6 = arith.constant 0 : index
    %c0_7 = arith.constant 0 : index
    %13 = vector.load %arg5[%c0_6, %c0_7] : memref<256x4xbf16, #tpu.memory_space<vmem>>, vector<256x4xbf16>
    tpu.vector_store %arg5[%c0_6, %c0_7], %12 {strides = array<i32>} : memref<256x4xbf16, #tpu.memory_space<vmem>>, vector<256x4xbf16>,
    %c0_8 = arith.constant 0 : index
    %c0_9 = arith.constant 0 : index
    %14 = vector.load %arg4[%c0_8, %c0_9] : memref<4x8xbf16, #tpu.memory_space<vmem>>, vector<4x8xbf16>
    %cst_10 = arith.constant dense<0.000000e+00> : vector<256x8xf32>
    %15 = tpu.matmul %12, %14, %cst_10 {dimension_numbers = #tpu.dot_dimension_numbers<[1], [0], [0], [1], [0, 0, 1, 1], [], []>} : vector<256x4xbf16>, vector<4x8xbf16>, vector<256x8xf32> -> vector<256x8xf32>
    %16 = arith.truncf %15 : vector<256x8xf32> to vector<256x8xbf16>
    %c0_11 = arith.constant 0 : index
    %c0_12 = arith.constant 0 : index
    %17 = vector.load %arg6[%c0_11, %c0_12] : memref<256x8xbf16, #tpu.memory_space<vmem>>, vector<256x8xbf16>
    tpu.vector_store %arg6[%c0_11, %c0_12], %16 {strides = array<i32>} : memref<256x8xbf16, #tpu.memory_space<vmem>>, vector<256x8xbf16>,
    return
  }
  func.func @transform_0(%arg0: i32) -> (i32, i32) {
    %c0_i32 = arith.constant 0 : i32
    %c0_i32_0 = arith.constant 0 : i32
    return %arg0, %c0_i32 : i32, i32
  }
  func.func @transform_1(%arg0: i32) -> (i32, i32) {
    %c0_i32 = arith.constant 0 : i32
    %c0_i32_0 = arith.constant 0 : i32
    %c0_i32_1 = arith.constant 0 : i32
    return %c0_i32, %c0_i32_0 : i32, i32
  }
  func.func @transform_2(%arg0: i32) -> (i32, i32) {
    %c0_i32 = arith.constant 0 : i32
    %c0_i32_0 = arith.constant 0 : i32
    %c0_i32_1 = arith.constant 0 : i32
    return %c0_i32, %c0_i32_0 : i32, i32
  }
  func.func @transform_3(%arg0: i32) -> (i32, i32) {
    %c0_i32 = arith.constant 0 : i32
    %c0_i32_0 = arith.constant 0 : i32
    %c0_i32_1 = arith.constant 0 : i32
    return %c0_i32, %c0_i32_0 : i32, i32
  }
  func.func @transform_4(%arg0: i32) -> (i32, i32) {
    %c0_i32 = arith.constant 0 : i32
    %c0_i32_0 = arith.constant 0 : i32
    return %arg0, %c0_i32 : i32, i32
  }
  func.func @transform_5(%arg0: i32) -> (i32, i32) {
    %c0_i32 = arith.constant 0 : i32
    %c0_i32_0 = arith.constant 0 : i32
    return %arg0, %c0_i32 : i32, i32
  }
}

</mosaic_0001>

<bundles_post_ra>
// kernel: tpu_custom_call.1
= control target key start
LH: loop header
LB: loop body
LE: loop exit
PB: predicated region body
PF: predicated region fallthrough
CT: control target
= control target key end

     0   :  { %s1336_s18 = smov 0   ;;  %s1627_s0 = inlined_call_operand.vmem [shape: f32[512,4], index: 0, kind: input, shape index: {}]   ;;  %s1628_s1 = inlined_call_operand.vmem [shape: f32[1,4], index: 1, kind: input, shape index: {}]   ;;  %s1629_s2 = inlined_call_operand.vmem [shape: f32[1,4], index: 2, kind: input, shape index: {}]   ;;  %s1630_s3 = inlined_call_operand.vmem [shape: bf16[4,8], index: 3, kind: input, shape index: {}]   ;;  %s1631_s4 = inlined_call_operand.vmem [shape: bf16[512,4], index: 4, kind: output, shape index: {0}]   ;;  %s1632_s5 = inlined_call_operand.vmem [shape: bf16[512,8], index: 5, kind: output, shape index: {1}]  }
   0x1 LB: > { %s1076_s19 = sadd.s32 4294967295, %s1304_s18   ;;  %p1080_p0 = scmp.ge.s32.totalorder %s1304_s18, 1  ;;  %s1304_s18 = sphi %s1336_s18, %s16_s18  }
   0x2   : > { %p191_p1 = scmp.lt.s32.totalorder %s1304_s18, 3 }
   0x4   : > { %p192_p2 = pnand %p1080_p0, %p191_p1 }
   0x5   : > { %v610_v0 = vld [vmem:[%s1630_s3] sm:$0x3] (!%p192_p2)  ;;  %vm660_vm0 = vcmask (!%p192_p2), 1041408   ;;  %s1081_s22 = sshll.u32 (!%p192_p2), %s1076_s19, 5  ;;  %vm577_vm1 = vcmask (!%p192_p2), 27648   ;;  %vm611_vm2 = vcmask (!%p192_p2), 31744  }
   0x6   : > { %195 = sbr.rel (%p192_p2) target bundleno = 292 (0x124), region = 36  ;;  %1288 = vmatprep.subr.msk.bf16.mxu0 (!%p192_p2), %vm660_vm0, %v610_v0  ;;  %1289 = vmatprep.subr.msk.bf16.mxu1 (!%p192_p2), %vm660_vm0, %v610_v0  ;;  %v662_v1 = vsel (!%p192_p2), %vm660_vm0, %v610_v0, 0  ;;  %p225_p3 = scmp.lt.s32.totalorder (!%p192_p2), %s1081_s22, 63  ;;  %v1353_v2 = vld [vmem:[%s1628_s1] ss:$0 sm:$0xff] (!%p192_p2) }
   0x7   : > { %1253 = vmatpush3.bf16.msra.mxu0 (!%p192_p2), %v662_v1  ;;  %1287 = vmatpush3.bf16.msra.mxu1 (!%p192_p2), %v662_v1  ;;  %v1363_v3 = vld [vmem:[%s1629_s2] ss:$0 sm:$0xff] (!%p192_p2) }
   0xd   : > { %s1634_s22 = smov (!%p225_p3, %s1081_s22), 63 }
   0xe   : > { %s1082_s23 = sshll.u32 %s1634_s22, 3  ;;  %s1084_s6 = sshll.u32 %s1634_s22, 2 }
   0xf   : > { %s1358_s28 = scalar_lea.vmem %s1627_s0, %s1082_s23  ;;  %s1393_s9 = scalar_lea.vmem %s1631_s4, %s1084_s6 }
  0x10   : > { %v243_v4 = vld [vmem:[%s1358_s28] sm:$0xff]  ;;  %v244_v5 = vld [vmem:[%s1358_s28 + $0x8] sm:$0xff]  ;;  %v245_v11 = vld [vmem:[%s1358_s28 + $0x10] sm:$0xff]  ;;  %s1558_s12 = scalar_lea.vmem %s1632_s5, %s1084_s6 }
  0x11   : > { %v259_v6 = vld [vmem:[%s1358_s28 + $0x80] sm:$0xff]  ;;  %v282_v7 = vmul.f32 %v1353_v2, %v243_v4  ;;  %v283_v8 = vmul.f32 %v1353_v2, %v244_v5  ;;  %v260_v9 = vld [vmem:[%s1358_s28 + $0x88] sm:$0xff]  ;;  %v246_v12 = vld [vmem:[%s1358_s28 + $0x18] sm:$0xff]  ;;  %v284_v14 = vmul.f32 %v1353_v2, %v245_v11 }
  0x12   : > { %v298_v10 = vmul.f32 %v1353_v2, %v259_v6  ;;  %v299_v13 = vmul.f32 %v1353_v2, %v260_v9  ;;  %v285_v15 = vmul.f32 %v1353_v2, %v246_v12  ;;  %v261_v16 = vld [vmem:[%s1358_s28 + $0x90] sm:$0xff]  ;;  %v262_v17 = vld [vmem:[%s1358_s28 + $0x98] sm:$0xff]  ;;  %v247_v36 = vld [vmem:[%s1358_s28 + $0x20] sm:$0xff] }
  0x13   : > { %v321_v18 = vadd.f32 %v1363_v3, %v282_v7  ;;  %v322_v19 = vadd.f32 %v1363_v3, %v283_v8  ;;  %v300_v21 = vmul.f32 %v1353_v2, %v261_v16  ;;  %v323_v23 = vadd.f32 %v1363_v3, %v284_v14  ;;  %v248_v37 = vld [vmem:[%s1358_s28 + $0x28] sm:$0xff]  ;;  %v263_v50 = vld [vmem:[%s1358_s28 + $0xa0] sm:$0xff]  ;;  %v249_v52 = vld [vmem:[%s1358_s28 + $0x30] sm:$0xff] }
  0x14   : > { %v337_v20 = vadd.f32 %v1363_v3, %v298_v10  ;;  %v338_v22 = vadd.f32 %v1363_v3, %v299_v13  ;;  %v324_v24 = vadd.f32 %v1363_v3, %v285_v15  ;;  %v301_v25 = vmul.f32 %v1353_v2, %v262_v17  ;;  %v264_v51 = vld [vmem:[%s1358_s28 + $0xa8] sm:$0xff]  ;;  %v250_v4 = vld [vmem:[%s1358_s28 + $0x38] sm:$0xff]  ;;  %v265_v5 = vld [vmem:[%s1358_s28 + $0xb0] sm:$0xff] }
  0x15   : > { %vm353_vm3 = vcmp.ge.f32.partialorder %v321_v18, 0.0  ;;  %vm354_vm4 = vcmp.ge.f32.partialorder %v322_v19, 0.0  ;;  %v385_v26 = vmul.f32 0.01, %v321_v18  ;;  %v386_v27 = vmul.f32 0.01, %v322_v19 }
  0x16   : > { %vm369_vm5 = vcmp.ge.f32.partialorder %v337_v20, 0.0  ;;  %vm370_vm6 = vcmp.ge.f32.partialorder %v338_v22, 0.0  ;;  %v401_v28 = vmul.f32 0.01, %v337_v20  ;;  %v402_v29 = vmul.f32 0.01, %v338_v22 }
  0x17   : > { %v417_v30 = vsel %vm353_vm3, %v321_v18, %v385_v26  ;;  %v418_v31 = vsel %vm354_vm4, %v322_v19, %v386_v27  ;;  %vm355_vm7 = vcmp.ge.f32.partialorder %v323_v23, 0.0  ;;  %vm356_vm8 = vcmp.ge.f32.partialorder %v324_v24, 0.0  ;;  %v266_v16 = vld [vmem:[%s1358_s28 + $0xb8] sm:$0xff]  ;;  %v251_v27 = vld [vmem:[%s1358_s28 + $0x40] sm:$0xff] }
  0x18   : > { %v449_v32 = vpack.c.bf16 %v418_v31, %v417_v30  ;;  %v1171_v33 = vpack.c.bf16 %v417_v30, %v417_v30  ;;  %v1172_v34 = vpack.c.bf16 %v418_v31, %v418_v31  ;;  %v433_v35 = vsel %vm369_vm5, %v337_v20, %v401_v28 }
  0x19   : > { %v434_v38 = vsel %vm370_vm6, %v338_v22, %v402_v29  ;;  %v1187_v39 = vpack.c.bf16 %v433_v35, %v433_v35  ;;  %v387_v40 = vmul.f32 0.01, %v323_v23  ;;  %v388_v41 = vmul.f32 0.01, %v324_v24 }
  0x1a   : > { %578 = vst.msk [vmem:[%s1393_s9] sm:$0xf] %vm577_vm1, %v1171_v33  ;;  %579 = vst.msk [vmem:[%s1393_s9 + $0x4] sm:$0xf] %vm577_vm1, %v1172_v34  ;;  %1254 = vmatprep.mubr.msk.bf16.mxu0 %vm611_vm2, %v449_v32  ;;  %v457_v42 = vpack.c.bf16 %v434_v38, %v433_v35  ;;  %v1188_v43 = vpack.c.bf16 %v434_v38, %v434_v38  ;;  %v339_v44 = vadd.f32 %v1363_v3, %v300_v21  ;;  %v252_v35 = vld [vmem:[%s1358_s28 + $0x48] sm:$0xff] }
  0x1b   : > { %v340_v45 = vadd.f32 %v1363_v3, %v301_v25  ;;  %594 = vst.msk [vmem:[%s1393_s9 + $0x40] sm:$0xf] %vm577_vm1, %v1187_v39  ;;  %v419_v46 = vsel %vm355_vm7, %v323_v23, %v387_v40  ;;  %v420_v47 = vsel %vm356_vm8, %v324_v24, %v388_v41  ;;  %v286_v48 = vmul.f32 %v1353_v2, %v247_v36  ;;  %v267_v40 = vld [vmem:[%s1358_s28 + $0xc0] sm:$0xff]  ;;  %v268_v41 = vld [vmem:[%s1358_s28 + $0xc8] sm:$0xff] }
  0x1c   : > { %v287_v49 = vmul.f32 %v1353_v2, %v248_v37  ;;  %595 = vst.msk [vmem:[%s1393_s9 + $0x44] sm:$0xf] %vm577_vm1, %v1188_v43  ;;  %1270 = vmatprep.mubr.msk.bf16.mxu1 %vm611_vm2, %v457_v42  ;;  %v450_v53 = vpack.c.bf16 %v420_v47, %v419_v46  ;;  %v1173_v54 = vpack.c.bf16 %v419_v46, %v419_v46  ;;  %vm371_vm9 = vcmp.ge.f32.partialorder %v339_v44, 0.0  ;;  %v253_v42 = vld [vmem:[%s1358_s28 + $0x50] sm:$0xff] }
  0x1d   : > { %v1174_v55 = vpack.c.bf16 %v420_v47, %v420_v47  ;;  %vm372_vm10 = vcmp.ge.f32.partialorder %v340_v45, 0.0  ;;  %v403_v56 = vmul.f32 0.01, %v339_v44  ;;  %v404_v57 = vmul.f32 0.01, %v340_v45 }
  0x1e   : > { %v325_v58 = vadd.f32 %v1363_v3, %v286_v48  ;;  %580 = vst.msk [vmem:[%s1393_s9 + $0x8] sm:$0xf] %vm577_vm1, %v1173_v54  ;;  %1255 = vmatmul.mubr.msk.bf16.vlgmr.msra.gmra.mrb[0].mxu0 %vm611_vm2, %v450_v53  ;;  %v326_v59 = vadd.f32 %v1363_v3, %v287_v49  ;;  %v302_v60 = vmul.f32 %v1353_v2, %v263_v50 }
  0x1f   : > { %581 = vst.msk [vmem:[%s1393_s9 + $0xc] sm:$0xf] %vm577_vm1, %v1174_v55  ;;  %v303_v61 = vmul.f32 %v1353_v2, %v264_v51  ;;  %v288_v62 = vmul.f32 %v1353_v2, %v249_v52  ;;  %v435_v63 = vsel %vm371_vm9, %v339_v44, %v403_v56  ;;  %v436_v0 = vsel %vm372_vm10, %v340_v45, %v404_v57  ;;  %v254_v52 = vld [vmem:[%s1358_s28 + $0x58] sm:$0xff] }
  0x20   : > { %vm357_vm11 = vcmp.ge.f32.partialorder %v325_v58, 0.0  ;;  %v389_v1 = vmul.f32 0.01, %v325_v58  ;;  %v458_v6 = vpack.c.bf16 %v436_v0, %v435_v63  ;;  %v1189_v7 = vpack.c.bf16 %v435_v63, %v435_v63 }
  0x21   : > { %v1190_v8 = vpack.c.bf16 %v436_v0, %v436_v0  ;;  %vm358_vm12 = vcmp.ge.f32.partialorder %v326_v59, 0.0  ;;  %v390_v9 = vmul.f32 0.01, %v326_v59  ;;  %v341_v11 = vadd.f32 %v1363_v3, %v302_v60 }
  0x22   : > { %v421_v10 = vsel %vm357_vm11, %v325_v58, %v389_v1  ;;  %v342_v12 = vadd.f32 %v1363_v3, %v303_v61  ;;  %596 = vst.msk [vmem:[%s1393_s9 + $0x48] sm:$0xf] %vm577_vm1, %v1189_v7  ;;  %1271 = vmatmul.mubr.msk.bf16.vlgmr.msra.gmra.mrb[0].mxu1 %vm611_vm2, %v458_v6  ;;  %v289_v14 = vmul.f32 %v1353_v2, %v250_v4 }
  0x23   : > { %597 = vst.msk [vmem:[%s1393_s9 + $0x4c] sm:$0xf] %vm577_vm1, %v1190_v8  ;;  %v1175_v13 = vpack.c.bf16 %v421_v10, %v421_v10  ;;  %v327_v15 = vadd.f32 %v1363_v3, %v288_v62  ;;  %v304_v17 = vmul.f32 %v1353_v2, %v265_v5  ;;  %v422_v18 = vsel %vm358_vm12, %v326_v59, %v390_v9 }
  0x24   : > { %vm373_vm13 = vcmp.ge.f32.partialorder %v341_v11, 0.0  ;;  %vm374_vm14 = vcmp.ge.f32.partialorder %v342_v12, 0.0  ;;  %v405_v19 = vmul.f32 0.01, %v341_v11  ;;  %v451_v20 = vpack.c.bf16 %v422_v18, %v421_v10 }
  0x25   : > { %v1176_v21 = vpack.c.bf16 %v422_v18, %v422_v18  ;;  %582 = vst.msk [vmem:[%s1393_s9 + $0x10] sm:$0xf] %vm577_vm1, %v1175_v13  ;;  %v406_v22 = vmul.f32 0.01, %v342_v12  ;;  %v328_v23 = vadd.f32 %v1363_v3, %v289_v14  ;;  %vm359_vm15 = vcmp.ge.f32.partialorder %v327_v15, 0.0  ;;  %v270_v13 = vld [vmem:[%s1358_s28 + $0xd8] sm:$0xff] }
  0x26   : > { %v437_v24 = vsel %vm373_vm13, %v341_v11, %v405_v19  ;;  %v391_v25 = vmul.f32 0.01, %v327_v15  ;;  %v305_v26 = vmul.f32 %v1353_v2, %v266_v16  ;;  %1258 = vmatprep.mubr.msk.bf16.mxu0 %vm611_vm2, %v451_v20  ;;  %v343_v34 = vadd.f32 %v1363_v3, %v304_v17  ;;  %v255_v14 = vld [vmem:[%s1358_s28 + $0x60] sm:$0xff]  ;;  %v256_v18 = vld [vmem:[%s1358_s28 + $0x68] sm:$0xff] }
  0x27   : > { %583 = vst.msk [vmem:[%s1393_s9 + $0x14] sm:$0xf] %vm577_vm1, %v1176_v21  ;;  %v438_v28 = vsel %vm374_vm14, %v342_v12, %v406_v22  ;;  %v1191_v29 = vpack.c.bf16 %v437_v24, %v437_v24  ;;  %vm360_vm0 = vcmp.ge.f32.partialorder %v328_v23, 0.0  ;;  %v392_v30 = vmul.f32 0.01, %v328_v23  ;;  %v269_v12 = vld [vmem:[%s1358_s28 + $0xd0] sm:$0xff] }
  0x28   : > { %v459_v31 = vpack.c.bf16 %v438_v28, %v437_v24  ;;  %v1192_v32 = vpack.c.bf16 %v438_v28, %v438_v28  ;;  %v423_v33 = vsel %vm359_vm15, %v327_v15, %v391_v25  ;;  %v344_v38 = vadd.f32 %v1363_v3, %v305_v26  ;;  %v271_v19 = vld [vmem:[%s1358_s28 + $0xe0] sm:$0xff] }
  0x29   : > { %598 = vst.msk [vmem:[%s1393_s9 + $0x50] sm:$0xf] %vm577_vm1, %v1191_v29  ;;  %v424_v36 = vsel %vm360_vm0, %v328_v23, %v392_v30  ;;  %v1177_v37 = vpack.c.bf16 %v423_v33, %v423_v33  ;;  %v290_v39 = vmul.f32 %v1353_v2, %v251_v27  ;;  %vm375_vm3 = vcmp.ge.f32.partialorder %v343_v34, 0.0  ;;  %v272_v27 = vld [vmem:[%s1358_s28 + $0xe8] sm:$0xff] }
  0x2a   : > { %599 = vst.msk [vmem:[%s1393_s9 + $0x54] sm:$0xf] %vm577_vm1, %v1192_v32  ;;  %1274 = vmatprep.mubr.msk.bf16.mxu1 %vm611_vm2, %v459_v31  ;;  %v452_v43 = vpack.c.bf16 %v424_v36, %v423_v33  ;;  %v1178_v44 = vpack.c.bf16 %v424_v36, %v424_v36  ;;  %v407_v45 = vmul.f32 0.01, %v343_v34  ;;  %vm376_vm4 = vcmp.ge.f32.partialorder %v344_v38, 0.0 }
  0x2b   : > { %584 = vst.msk [vmem:[%s1393_s9 + $0x18] sm:$0xf] %vm577_vm1, %v1177_v37  ;;  %v408_v46 = vmul.f32 0.01, %v344_v38  ;;  %v291_v47 = vmul.f32 %v1353_v2, %v252_v35  ;;  %v329_v48 = vadd.f32 %v1363_v3, %v290_v39  ;;  %v306_v50 = vmul.f32 %v1353_v2, %v267_v40 }
  0x2c   : > { %585 = vst.msk [vmem:[%s1393_s9 + $0x1c] sm:$0xf] %vm577_vm1, %v1178_v44  ;;  %1259 = vmatmul.mubr.msk.bf16.gmra.mrb[4].mxu0 %vm611_vm2, %v452_v43  ;;  %v439_v49 = vsel %vm375_vm3, %v343_v34, %v407_v45  ;;  %v307_v51 = vmul.f32 %v1353_v2, %v268_v41  ;;  %v292_v53 = vmul.f32 %v1353_v2, %v253_v42 }
  0x2d   : > { %v440_v54 = vsel %vm376_vm4, %v344_v38, %v408_v46  ;;  %v1193_v55 = vpack.c.bf16 %v439_v49, %v439_v49  ;;  %v330_v56 = vadd.f32 %v1363_v3, %v291_v47  ;;  %vm361_vm5 = vcmp.ge.f32.partialorder %v329_v48, 0.0  ;;  %v257_v47 = vld [vmem:[%s1358_s28 + $0x70] sm:$0xff] }
  0x2e   : > { %v460_v57 = vpack.c.bf16 %v440_v54, %v439_v49  ;;  %v1194_v58 = vpack.c.bf16 %v440_v54, %v440_v54  ;;  %v393_v59 = vmul.f32 0.01, %v329_v48  ;;  %v345_v60 = vadd.f32 %v1363_v3, %v306_v50  ;;  %v274_v54 = vld [vmem:[%s1358_s28 + $0xf8] sm:$0xff] }
  0x2f   : > { %600 = vst.msk [vmem:[%s1393_s9 + $0x58] sm:$0xf] %vm577_vm1, %v1193_v55  ;;  %vm362_vm6 = vcmp.ge.f32.partialorder %v330_v56, 0.0  ;;  %v394_v61 = vmul.f32 0.01, %v330_v56  ;;  %v346_v62 = vadd.f32 %v1363_v3, %v307_v51  ;;  %v293_v63 = vmul.f32 %v1353_v2, %v254_v52  ;;  %v258_v52 = vld [vmem:[%s1358_s28 + $0x78] sm:$0xff] }
  0x30   : > { %601 = vst.msk [vmem:[%s1393_s9 + $0x5c] sm:$0xf] %vm577_vm1, %v1194_v58  ;;  %1275 = vmatmul.mubr.msk.bf16.gmra.mrb[4].mxu1 %vm611_vm2, %v460_v57  ;;  %v425_v0 = vsel %vm361_vm5, %v329_v48, %v393_v59  ;;  %vm377_vm7 = vcmp.ge.f32.partialorder %v345_v60, 0.0  ;;  %v409_v1 = vmul.f32 0.01, %v345_v60  ;;  %v331_v4 = vadd.f32 %v1363_v3, %v292_v53  ;;  %v273_v53 = vld [vmem:[%s1358_s28 + $0xf0] sm:$0xff] }
  0x31   : > { %v426_v5 = vsel %vm362_vm6, %v330_v56, %v394_v61  ;;  %v1179_v6 = vpack.c.bf16 %v425_v0, %v425_v0  ;;  %vm378_vm8 = vcmp.ge.f32.partialorder %v346_v62, 0.0  ;;  %v410_v7 = vmul.f32 0.01, %v346_v62 }
  0x32   : > { %v453_v8 = vpack.c.bf16 %v426_v5, %v425_v0  ;;  %v1180_v9 = vpack.c.bf16 %v426_v5, %v426_v5  ;;  %v441_v10 = vsel %vm377_vm7, %v345_v60, %v409_v1  ;;  %v332_v11 = vadd.f32 %v1363_v3, %v293_v63 }
  0x33   : > { %586 = vst.msk [vmem:[%s1393_s9 + $0x20] sm:$0xf] %vm577_vm1, %v1179_v6  ;;  %v442_v15 = vsel %vm378_vm8, %v346_v62, %v410_v7  ;;  %v1195_v16 = vpack.c.bf16 %v441_v10, %v441_v10  ;;  %vm363_vm9 = vcmp.ge.f32.partialorder %v331_v4, 0.0  ;;  %v395_v17 = vmul.f32 0.01, %v331_v4 }
  0x34   : > { %587 = vst.msk [vmem:[%s1393_s9 + $0x24] sm:$0xf] %vm577_vm1, %v1180_v9  ;;  %1262 = vmatprep.mubr.msk.bf16.mxu0 %vm611_vm2, %v453_v8  ;;  %v461_v20 = vpack.c.bf16 %v442_v15, %v441_v10  ;;  %v1196_v21 = vpack.c.bf16 %v442_v15, %v442_v15  ;;  %vm364_vm10 = vcmp.ge.f32.partialorder %v332_v11, 0.0  ;;  %v396_v22 = vmul.f32 0.01, %v332_v11 }
  0x35   : > { %602 = vst.msk [vmem:[%s1393_s9 + $0x60] sm:$0xf] %vm577_vm1, %v1195_v16  ;;  %v427_v23 = vsel %vm363_vm9, %v331_v4, %v395_v17  ;;  %v308_v24 = vmul.f32 %v1353_v2, %v269_v12  ;;  %v309_v25 = vmul.f32 %v1353_v2, %v270_v13  ;;  %v294_v26 = vmul.f32 %v1353_v2, %v255_v14 }
  0x36   : > { %603 = vst.msk [vmem:[%s1393_s9 + $0x64] sm:$0xf] %vm577_vm1, %v1196_v21  ;;  %1278 = vmatprep.mubr.msk.bf16.mxu1 %vm611_vm2, %v461_v20  ;;  %v428_v28 = vsel %vm364_vm10, %v332_v11, %v396_v22  ;;  %v1181_v29 = vpack.c.bf16 %v427_v23, %v427_v23  ;;  %v295_v30 = vmul.f32 %v1353_v2, %v256_v18  ;;  %vm953_vm7 = vcmask 60416  }
  0x37   : > { %v310_v31 = vmul.f32 %v1353_v2, %v271_v19  ;;  %v454_v32 = vpack.c.bf16 %v428_v28, %v427_v23  ;;  %v1182_v33 = vpack.c.bf16 %v428_v28, %v428_v28  ;;  %v347_v34 = vadd.f32 %v1363_v3, %v308_v24 }
  0x38   : > { %v348_v35 = vadd.f32 %v1363_v3, %v309_v25  ;;  %588 = vst.msk [vmem:[%s1393_s9 + $0x28] sm:$0xf] %vm577_vm1, %v1181_v29  ;;  %v333_v36 = vadd.f32 %v1363_v3, %v294_v26  ;;  %v334_v37 = vadd.f32 %v1363_v3, %v295_v30  ;;  %v311_v38 = vmul.f32 %v1353_v2, %v272_v27 }
  0x39   : > { %v349_v39 = vadd.f32 %v1363_v3, %v310_v31  ;;  %589 = vst.msk [vmem:[%s1393_s9 + $0x2c] sm:$0xf] %vm577_vm1, %v1182_v33  ;;  %1263 = vmatmul.mubr.msk.bf16.gmra.mrb[8].mxu0 %vm611_vm2, %v454_v32  ;;  %vm379_vm11 = vcmp.ge.f32.partialorder %v347_v34, 0.0  ;;  %v411_v40 = vmul.f32 0.01, %v347_v34  ;;  %v296_v61 = vmul.f32 %v1353_v2, %v257_v47 }
  0x3a   : > { %vm380_vm12 = vcmp.ge.f32.partialorder %v348_v35, 0.0  ;;  %v412_v41 = vmul.f32 0.01, %v348_v35  ;;  %vm365_vm13 = vcmp.ge.f32.partialorder %v333_v36, 0.0  ;;  %vm366_vm14 = vcmp.ge.f32.partialorder %v334_v37, 0.0 }
  0x3b   : > { %v397_v42 = vmul.f32 0.01, %v333_v36  ;;  %v398_v43 = vmul.f32 0.01, %v334_v37  ;;  %v443_v44 = vsel %vm379_vm11, %v347_v34, %v411_v40  ;;  %v350_v46 = vadd.f32 %v1363_v3, %v311_v38 }
  0x3c   : > { %v444_v45 = vsel %vm380_vm12, %v348_v35, %v412_v41  ;;  %vm381_vm15 = vcmp.ge.f32.partialorder %v349_v39, 0.0  ;;  %v1197_v49 = vpack.c.bf16 %v443_v44, %v443_v44  ;;  %v413_v57 = vmul.f32 0.01, %v349_v39 }
  0x3d   : > { %v462_v48 = vpack.c.bf16 %v444_v45, %v443_v44  ;;  %v1198_v50 = vpack.c.bf16 %v444_v45, %v444_v45  ;;  %v429_v51 = vsel %vm365_vm13, %v333_v36, %v397_v42  ;;  %v430_v55 = vsel %vm366_vm14, %v334_v37, %v398_v43 }
  0x3e   : > { %v1183_v56 = vpack.c.bf16 %v429_v51, %v429_v51  ;;  %vm382_vm0 = vcmp.ge.f32.partialorder %v350_v46, 0.0  ;;  %604 = vst.msk [vmem:[%s1393_s9 + $0x68] sm:$0xf] %vm577_vm1, %v1197_v49  ;;  %v455_v58 = vpack.c.bf16 %v430_v55, %v429_v51  ;;  %v1184_v59 = vpack.c.bf16 %v430_v55, %v430_v55 }
  0x3f   : > { %605 = vst.msk [vmem:[%s1393_s9 + $0x6c] sm:$0xf] %vm577_vm1, %v1198_v50  ;;  %1279 = vmatmul.mubr.msk.bf16.gmra.mrb[8].mxu1 %vm611_vm2, %v462_v48  ;;  %v414_v60 = vmul.f32 0.01, %v350_v46  ;;  %v445_v62 = vsel %vm381_vm15, %v349_v39, %v413_v57  ;;  %v297_v63 = vmul.f32 %v1353_v2, %v258_v52  ;;  %v312_v0 = vmul.f32 %v1353_v2, %v273_v53 }
  0x40   : > { %590 = vst.msk [vmem:[%s1393_s9 + $0x30] sm:$0xf] %vm577_vm1, %v1183_v56  ;;  %v313_v1 = vmul.f32 %v1353_v2, %v274_v54  ;;  %591 = vst.msk [vmem:[%s1393_s9 + $0x34] sm:$0xf] %vm577_vm1, %v1184_v59  ;;  %1266 = vmatprep.mubr.msk.bf16.mxu0 %vm611_vm2, %v455_v58  ;;  %v1199_v5 = vpack.c.bf16 %v445_v62, %v445_v62  ;;  %v335_v6 = vadd.f32 %v1363_v3, %v296_v61 }
  0x41   : > { %v446_v4 = vsel %vm382_vm0, %v350_v46, %v414_v60  ;;  %v336_v9 = vadd.f32 %v1363_v3, %v297_v63  ;;  %v351_v10 = vadd.f32 %v1363_v3, %v312_v0 }
  0x42   : > { %v463_v7 = vpack.c.bf16 %v446_v4, %v445_v62  ;;  %v1200_v8 = vpack.c.bf16 %v446_v4, %v446_v4  ;;  %606 = vst.msk [vmem:[%s1393_s9 + $0x70] sm:$0xf] %vm577_vm1, %v1199_v5  ;;  %vm367_vm3 = vcmp.ge.f32.partialorder %v335_v6, 0.0  ;;  %v399_v11 = vmul.f32 0.01, %v335_v6 }
  0x43   : > { %v352_v2 = vadd.f32 %v1363_v3, %v313_v1  ;;  %vm368_vm4 = vcmp.ge.f32.partialorder %v336_v9, 0.0  ;;  %v400_v12 = vmul.f32 0.01, %v336_v9  ;;  %vm383_vm5 = vcmp.ge.f32.partialorder %v351_v10, 0.0 }
  0x44   : > { %607 = vst.msk [vmem:[%s1393_s9 + $0x74] sm:$0xf] %vm577_vm1, %v1200_v8  ;;  %1282 = vmatprep.mubr.msk.bf16.mxu1 %vm611_vm2, %v463_v7  ;;  %v415_v13 = vmul.f32 0.01, %v351_v10  ;;  %v431_v14 = vsel %vm367_vm3, %v335_v6, %v399_v11 }
  0x45   : > { %vm384_vm6 = vcmp.ge.f32.partialorder %v352_v2, 0.0  ;;  %v416_v15 = vmul.f32 0.01, %v352_v2  ;;  %v432_v16 = vsel %vm368_vm4, %v336_v9, %v400_v12  ;;  %v1185_v17 = vpack.c.bf16 %v431_v14, %v431_v14 }
  0x46   : > { %v447_v18 = vsel %vm383_vm5, %v351_v10, %v415_v13  ;;  %v456_v3 = vpack.c.bf16 %v432_v16, %v431_v14  ;;  %v1186_v19 = vpack.c.bf16 %v432_v16, %v432_v16 }
  0x47   : > { %v448_v20 = vsel %vm384_vm6, %v352_v2, %v416_v15  ;;  %v1201_v21 = vpack.c.bf16 %v447_v18, %v447_v18  ;;  %592 = vst.msk [vmem:[%s1393_s9 + $0x38] sm:$0xf] %vm577_vm1, %v1185_v17 }
  0x48   : > { %v464_v22 = vpack.c.bf16 %v448_v20, %v447_v18  ;;  %v1202_v23 = vpack.c.bf16 %v448_v20, %v448_v20  ;;  %593 = vst.msk [vmem:[%s1393_s9 + $0x3c] sm:$0xf] %vm577_vm1, %v1186_v19  ;;  %1267 = vmatmul.mubr.msk.bf16.gmra.mrb[12].mxu0 %vm611_vm2, %v456_v3 }
  0x49   : > { %608 = vst.msk [vmem:[%s1393_s9 + $0x78] sm:$0xf] %vm577_vm1, %v1201_v21 }
  0x4a   : > { %609 = vst.msk [vmem:[%s1393_s9 + $0x7c] sm:$0xf] %vm577_vm1, %v1202_v23  ;;  %1283 = vmatmul.mubr.msk.bf16.gmra.mrb[12].mxu1 %vm611_vm2, %v464_v22 }
  0xf1   : > { %v1256_v24 = vpop.f32.mrb[0].mxu0 }
  0xf2   : > { %v1205_v25 = vpack.c.bf16 %v1256_v24, %v1256_v24  ;;  %v698_v26 = vpop.f32.mrb[1].mxu0 }
  0xf3   : > { %v1203_v27 = vpack.c.bf16 %v698_v26, %v698_v26  ;;  %v1257_v28 = vpop.f32.mrb[2].mxu0 }
  0xf4   : > { %956 = vst.msk [vmem:[%s1558_s12 + $0x8] sm:$0xf] %vm953_vm7, %v1205_v25  ;;  %v1206_v29 = vpack.c.bf16 %v1257_v28, %v1257_v28  ;;  %v701_v30 = vpop.f32.mrb[3].mxu0 }
  0xf5   : > { %v1272_v31 = vpop.f32.mrb[0].mxu1  ;;  %954 = vst.msk [vmem:[%s1558_s12] sm:$0xf] %vm953_vm7, %v1203_v27  ;;  %v1204_v32 = vpack.c.bf16 %v701_v30, %v701_v30 }
  0xf6   : > { %v1221_v33 = vpack.c.bf16 %v1272_v31, %v1272_v31  ;;  %v762_v34 = vpop.f32.mrb[1].mxu1  ;;  %957 = vst.msk [vmem:[%s1558_s12 + $0xc] sm:$0xf] %vm953_vm7, %v1206_v29 }
  0xf7   : > { %v1219_v35 = vpack.c.bf16 %v762_v34, %v762_v34  ;;  %v1273_v36 = vpop.f32.mrb[2].mxu1  ;;  %955 = vst.msk [vmem:[%s1558_s12 + $0x4] sm:$0xf] %vm953_vm7, %v1204_v32 }
  0xf8   : > { %972 = vst.msk [vmem:[%s1558_s12 + $0x48] sm:$0xf] %vm953_vm7, %v1221_v33  ;;  %v1222_v37 = vpack.c.bf16 %v1273_v36, %v1273_v36  ;;  %v765_v38 = vpop.f32.mrb[3].mxu1 }
  0xf9   : > { %970 = vst.msk [vmem:[%s1558_s12 + $0x40] sm:$0xf] %vm953_vm7, %v1219_v35  ;;  %v1220_v39 = vpack.c.bf16 %v765_v38, %v765_v38 }
  0xfa   : > { %973 = vst.msk [vmem:[%s1558_s12 + $0x4c] sm:$0xf] %vm953_vm7, %v1222_v37 }
  0xfb   : > { %971 = vst.msk [vmem:[%s1558_s12 + $0x44] sm:$0xf] %vm953_vm7, %v1220_v39 }
  0xff   : > { %v1260_v40 = vpop.f32.mrb[4].mxu0 }
 0x100   : > { %v1209_v41 = vpack.c.bf16 %v1260_v40, %v1260_v40  ;;  %v714_v42 = vpop.f32.mrb[5].mxu0 }
 0x101   : > { %v1207_v43 = vpack.c.bf16 %v714_v42, %v714_v42  ;;  %v1261_v44 = vpop.f32.mrb[6].mxu0 }
 0x102   : > { %960 = vst.msk [vmem:[%s1558_s12 + $0x18] sm:$0xf] %vm953_vm7, %v1209_v41  ;;  %v1210_v45 = vpack.c.bf16 %v1261_v44, %v1261_v44  ;;  %v717_v46 = vpop.f32.mrb[7].mxu0 }
 0x103   : > { %v1276_v47 = vpop.f32.mrb[4].mxu1  ;;  %958 = vst.msk [vmem:[%s1558_s12 + $0x10] sm:$0xf] %vm953_vm7, %v1207_v43  ;;  %v1208_v48 = vpack.c.bf16 %v717_v46, %v717_v46 }
 0x104   : > { %v1225_v49 = vpack.c.bf16 %v1276_v47, %v1276_v47  ;;  %v778_v50 = vpop.f32.mrb[5].mxu1  ;;  %961 = vst.msk [vmem:[%s1558_s12 + $0x1c] sm:$0xf] %vm953_vm7, %v1210_v45 }
 0x105   : > { %v1223_v51 = vpack.c.bf16 %v778_v50, %v778_v50  ;;  %v1277_v52 = vpop.f32.mrb[6].mxu1  ;;  %959 = vst.msk [vmem:[%s1558_s12 + $0x14] sm:$0xf] %vm953_vm7, %v1208_v48 }
 0x106   : > { %976 = vst.msk [vmem:[%s1558_s12 + $0x58] sm:$0xf] %vm953_vm7, %v1225_v49  ;;  %v1226_v53 = vpack.c.bf16 %v1277_v52, %v1277_v52  ;;  %v781_v54 = vpop.f32.mrb[7].mxu1 }
 0x107   : > { %974 = vst.msk [vmem:[%s1558_s12 + $0x50] sm:$0xf] %vm953_vm7, %v1223_v51  ;;  %v1224_v55 = vpack.c.bf16 %v781_v54, %v781_v54 }
 0x108   : > { %977 = vst.msk [vmem:[%s1558_s12 + $0x5c] sm:$0xf] %vm953_vm7, %v1226_v53 }
 0x109   : > { %975 = vst.msk [vmem:[%s1558_s12 + $0x54] sm:$0xf] %vm953_vm7, %v1224_v55 }
 0x10c   : > { %v1264_v56 = vpop.f32.mrb[8].mxu0 }
 0x10d   : > { %v1213_v57 = vpack.c.bf16 %v1264_v56, %v1264_v56  ;;  %v730_v58 = vpop.f32.mrb[9].mxu0 }
 0x10e   : > { %v1211_v59 = vpack.c.bf16 %v730_v58, %v730_v58  ;;  %v1265_v60 = vpop.f32.mrb[10].mxu0 }
 0x10f   : > { %964 = vst.msk [vmem:[%s1558_s12 + $0x28] sm:$0xf] %vm953_vm7, %v1213_v57  ;;  %v1214_v61 = vpack.c.bf16 %v1265_v60, %v1265_v60  ;;  %v733_v62 = vpop.f32.mrb[11].mxu0 }
 0x110   : > { %962 = vst.msk [vmem:[%s1558_s12 + $0x20] sm:$0xf] %vm953_vm7, %v1211_v59  ;;  %v1212_v63 = vpack.c.bf16 %v733_v62, %v733_v62 }
 0x111   : > { %965 = vst.msk [vmem:[%s1558_s12 + $0x2c] sm:$0xf] %vm953_vm7, %v1214_v61 }
 0x112   : > { %v1280_v0 = vpop.f32.mrb[8].mxu1  ;;  %963 = vst.msk [vmem:[%s1558_s12 + $0x24] sm:$0xf] %vm953_vm7, %v1212_v63 }
 0x113   : > { %v1229_v1 = vpack.c.bf16 %v1280_v0, %v1280_v0  ;;  %v794_v4 = vpop.f32.mrb[9].mxu1 }
 0x114   : > { %v1227_v5 = vpack.c.bf16 %v794_v4, %v794_v4  ;;  %v1281_v6 = vpop.f32.mrb[10].mxu1 }
 0x115   : > { %980 = vst.msk [vmem:[%s1558_s12 + $0x68] sm:$0xf] %vm953_vm7, %v1229_v1  ;;  %v1230_v7 = vpack.c.bf16 %v1281_v6, %v1281_v6  ;;  %v797_v8 = vpop.f32.mrb[11].mxu1 }
 0x116   : > { %978 = vst.msk [vmem:[%s1558_s12 + $0x60] sm:$0xf] %vm953_vm7, %v1227_v5  ;;  %v1228_v9 = vpack.c.bf16 %v797_v8, %v797_v8 }
 0x117   : > { %981 = vst.msk [vmem:[%s1558_s12 + $0x6c] sm:$0xf] %vm953_vm7, %v1230_v7 }
 0x118   : > { %979 = vst.msk [vmem:[%s1558_s12 + $0x64] sm:$0xf] %vm953_vm7, %v1228_v9 }
 0x11b   : > { %v1268_v10 = vpop.f32.mrb[12].mxu0 }
 0x11c   : > { %v1217_v11 = vpack.c.bf16 %v1268_v10, %v1268_v10  ;;  %v746_v12 = vpop.f32.mrb[13].mxu0 }
 0x11d   : > { %v1284_v2 = vpop.f32.mrb[12].mxu1  ;;  %v1215_v14 = vpack.c.bf16 %v746_v12, %v746_v12  ;;  %v1269_v16 = vpop.f32.mrb[14].mxu0 }
 0x11e   : > { %v1233_v13 = vpack.c.bf16 %v1284_v2, %v1284_v2  ;;  %v810_v15 = vpop.f32.mrb[13].mxu1  ;;  %968 = vst.msk [vmem:[%s1558_s12 + $0x38] sm:$0xf] %vm953_vm7, %v1217_v11  ;;  %v1218_v18 = vpack.c.bf16 %v1269_v16, %v1269_v16  ;;  %v749_v19 = vpop.f32.mrb[15].mxu0 }
 0x11f   : > { %v1231_v17 = vpack.c.bf16 %v810_v15, %v810_v15  ;;  %v1285_v3 = vpop.f32.mrb[14].mxu1  ;;  %966 = vst.msk [vmem:[%s1558_s12 + $0x30] sm:$0xf] %vm953_vm7, %v1215_v14  ;;  %v1216_v21 = vpack.c.bf16 %v749_v19, %v749_v19 }
 0x120   : > { %984 = vst.msk [vmem:[%s1558_s12 + $0x78] sm:$0xf] %vm953_vm7, %v1233_v13  ;;  %v1234_v20 = vpack.c.bf16 %v1285_v3, %v1285_v3  ;;  %v813_v22 = vpop.f32.mrb[15].mxu1  ;;  %969 = vst.msk [vmem:[%s1558_s12 + $0x3c] sm:$0xf] %vm953_vm7, %v1218_v18 }
 0x121   : > { %982 = vst.msk [vmem:[%s1558_s12 + $0x70] sm:$0xf] %vm953_vm7, %v1231_v17  ;;  %v1232_v23 = vpack.c.bf16 %v813_v22, %v813_v22  ;;  %967 = vst.msk [vmem:[%s1558_s12 + $0x34] sm:$0xf] %vm953_vm7, %v1216_v21 }
 0x122   : > { %985 = vst.msk [vmem:[%s1558_s12 + $0x7c] sm:$0xf] %vm953_vm7, %v1234_v20 }
 0x123   : > { %983 = vst.msk [vmem:[%s1558_s12 + $0x74] sm:$0xf] %vm953_vm7, %v1232_v23 }
 0x124 PF: > { %s16_s18 = sadd.s32 1, %s1304_s18  }
 0x125   : > { %p13_p4 = scmp.ge.s32.totalorder %s16_s18, 4  }
 0x127   :  { %15 = sbr.rel (!%p13_p4) target bundleno = 1 (0x1), region = 78 }

</bundles_post_ra>
